<compile_context>
chip_gen: v7x
topology: tpu7x:2x2x1
jax: 0.10.0
libtpu: 0.0.40
codegen_flags: <defaults>
</compile_context>

<pallas_src>
import functools

import jax
import jax.numpy as jnp
from jax.experimental import pallas as pl
from jax.experimental.pallas import tpu as pltpu


def _round_up(x, m):
    return (x + m - 1) // m * m


def _sublane(dtype):
    return {4: 8, 2: 16, 1: 32}.get(jnp.dtype(dtype).itemsize, 8)


def _padded_tile_bytes(rows, cols, dtype):
    """VMEM bytes for a 2-D tile after (sublane, 128-lane) padding."""
    it = jnp.dtype(dtype).itemsize
    return _round_up(rows, _sublane(dtype)) * _round_up(cols, 128) * it


# ----------------------------- kernels --------------------------------------


def _se_flat_kernel(x_ref, w1_ref, w2_ref, pool_ref, expand_ref, o_ref, *, inv_l):
    """Lane-dense path: x_ref / o_ref are (block_b, C*L)."""
    x = x_ref[...]                                               # native dtype, no f32 copy

    # Squeeze: per-channel mean via one-hot pooling matmul (MXU, f32 accumulation).
    y = jnp.dot(x, pool_ref[...], preferred_element_type=jnp.float32) * inv_l   # (bB, C)

    # Excitation: Linear(C -> C/r) + ReLU, Linear(C/r -> C) + Sigmoid.
    h = jnp.maximum(jnp.dot(y, w1_ref[...], preferred_element_type=jnp.float32), 0.0)
    z = jnp.dot(h, w2_ref[...], preferred_element_type=jnp.float32)
    s = 1.0 / (1.0 + jnp.exp(-z))                                # (bB, C); exp on EUP

    # Expand gate to (bB, C*L) via one-hot matmul; scale x in its native dtype.
    gate = jnp.dot(s, expand_ref[...], preferred_element_type=jnp.float32)
    o_ref[...] = x * gate.astype(o_ref.dtype)


def _se_ncl_kernel(x_ref, w1_ref, w2_ref, o_ref, *, inv_l):
    """Fallback path: x_ref / o_ref are native NCL blocks (block_b, C, L)."""
    x = x_ref[...]
    y = jnp.sum(x, axis=-1, dtype=jnp.float32) * inv_l           # (bB, C)
    h = jnp.maximum(jnp.dot(y, w1_ref[...], preferred_element_type=jnp.float32), 0.0)
    z = jnp.dot(h, w2_ref[...], preferred_element_type=jnp.float32)
    s = 1.0 / (1.0 + jnp.exp(-z))
    o_ref[...] = x * s[:, :, None].astype(o_ref.dtype)


# ----------------------------- wrapper ---------------------------------------


def se_block(x, w1, w2, *, block_b=None, force_ncl=False):
    """SE block on NCL input. x: (B, C, L); w1: (C, C//r); w2: (C//r, C)."""
    B, C, L = x.shape
    Cr = w1.shape[1]
    assert w1.shape == (C, Cr) and w2.shape == (Cr, C)

    CL = C * L
    x_dtype = x.dtype
    itemsize = jnp.dtype(x_dtype).itemsize
    sub = _sublane(x_dtype)

    # The one-hot pool/expand matrices scale as C^2 * L; only use the flattened
    # lane-dense path while they stay small and C*L is 128-aligned.
    onehot_bytes = (_padded_tile_bytes(CL, C, x_dtype)
                    + _padded_tile_bytes(C, CL, jnp.float32))
    use_flat = (not force_ncl) and (CL % 128 == 0) and (onehot_bytes <= 8 * 1024 * 1024)

    # Padded bytes for one batch row of the activation block.
    if use_flat:
        padded_row_bytes = _round_up(CL, 128) * itemsize
    else:
        padded_row_bytes = _padded_tile_bytes(C, L, x_dtype)

    if block_b is None:
        target = 8 * 1024 * 1024                    # ~8 MiB per pipeline buffer
        bb = max(1, target // padded_row_bytes)
        if B >= 2 * sub:
            bb = min(bb, B // 2)                    # keep >= 2 grid steps (megacore/pipeline)
        bb = min(bb, B)
        if bb < B:
            bb = (bb // sub) * sub                  # sublane-aligned blocks
            if bb == 0:
                bb = B                              # too small to split cleanly
        block_b = bb
    block_b = int(block_b)

    grid = (pl.cdiv(B, block_b),)

    # Padded-byte VMEM accounting (lanes round to 128, sublanes to 8/16/32).
    if use_flat:
        blk_bytes = _padded_tile_bytes(block_b, CL, x_dtype)
    else:
        blk_bytes = block_b * _padded_tile_bytes(C, L, x_dtype)
    param_bytes = (_padded_tile_bytes(C, Cr, w1.dtype)
                   + _padded_tile_bytes(Cr, C, w2.dtype))
    if use_flat:
        param_bytes += onehot_bytes
    # in + out double-buffered, params double-buffered, plus slack; capped well
    # below v7x's 64 MiB physical VMEM.
    vmem_limit = int(min(48 * 1024 * 1024,
                         max(8 * 1024 * 1024,
                             4 * blk_bytes + 2 * param_bytes + (2 << 20))))

    w_bytes = int(w1.size * jnp.dtype(w1.dtype).itemsize
                  + w2.size * jnp.dtype(w2.dtype).itemsize)
    if use_flat:
        flops = 2 * B * CL * C + 2 * B * C * CL     # pool + expand matmuls
        extra_bytes = onehot_bytes
    else:
        flops = B * CL                              # lane reduce
        extra_bytes = 0
    flops += 2 * B * C * Cr + 2 * B * Cr * C + B * CL
    cost = pl.CostEstimate(
        flops=int(flops),
        transcendentals=int(B * C),
        bytes_accessed=int(2 * B * CL * itemsize + w_bytes + extra_bytes),
    )

    compiler_params = pltpu.CompilerParams(
        dimension_semantics=("parallel",),
        vmem_limit_bytes=vmem_limit,
    )
    inv_l = float(1.0 / L)

    if use_flat:
        # Contiguous reshape: layout bitcast, no HBM traffic (unlike a transpose).
        x_flat = x.reshape(B, CL)
        pool = (jnp.arange(CL, dtype=jnp.int32)[:, None] // L
                == jnp.arange(C, dtype=jnp.int32)[None, :]).astype(x_dtype)            # (CL, C)
        expand = (jnp.arange(C, dtype=jnp.int32)[:, None]
                  == jnp.arange(CL, dtype=jnp.int32)[None, :] // L).astype(jnp.float32)  # (C, CL)
        out_flat = pl.pallas_call(
            functools.partial(_se_flat_kernel, inv_l=inv_l),
            out_shape=jax.ShapeDtypeStruct((B, CL), x_dtype),
            grid=grid,
            in_specs=[
                pl.BlockSpec((block_b, CL), lambda i: (i, 0)),
                pl.BlockSpec((C, Cr), lambda i: (0, 0)),
                pl.BlockSpec((Cr, C), lambda i: (0, 0)),
                pl.BlockSpec((CL, C), lambda i: (0, 0)),
                pl.BlockSpec((C, CL), lambda i: (0, 0)),
            ],
            out_specs=pl.BlockSpec((block_b, CL), lambda i: (i, 0)),
            compiler_params=compiler_params,
            cost_estimate=cost,
        )(x_flat, w1, w2, pool, expand)
        return out_flat.reshape(B, C, L)

    return pl.pallas_call(
        functools.partial(_se_ncl_kernel, inv_l=inv_l),
        out_shape=jax.ShapeDtypeStruct((B, C, L), x_dtype),
        grid=grid,
        in_specs=[
            pl.BlockSpec((block_b, C, L), lambda i: (i, 0, 0)),
            pl.BlockSpec((C, Cr), lambda i: (0, 0)),
            pl.BlockSpec((Cr, C), lambda i: (0, 0)),
        ],
        out_specs=pl.BlockSpec((block_b, C, L), lambda i: (i, 0, 0)),
        compiler_params=compiler_params,
        cost_estimate=cost,
    )(x, w1, w2)


def se_block_reference(x, w1, w2):
    """Pure-JAX reference mirroring the PyTorch forward."""
    y = jnp.mean(x.astype(jnp.float32), axis=-1)                 # (B, C)
    h = jnp.maximum(y @ w1.astype(jnp.float32), 0.0)             # (B, C//r)
    s = 1.0 / (1.0 + jnp.exp(-(h @ w2.astype(jnp.float32))))     # (B, C)
    return (x * s[:, :, None].astype(x.dtype)).astype(x.dtype)


if __name__ == "__main__":
    C, L, reduction = 64, 16, 16
    Cr = C // reduction

    key = jax.random.PRNGKey(0)
    kx, k1, k2, kx2 = jax.random.split(key, 4)

    # PyTorch nn.Linear stores W as (out, in) and computes y @ W.T; weights are
    # kept pre-transposed so the kernel does plain row-major matmuls.
    w1 = jax.random.normal(k1, (C, Cr), dtype=jnp.float32) * 0.1   # Linear(C -> C//r).weight.T
    w2 = jax.random.normal(k2, (Cr, C), dtype=jnp.float32) * 0.1   # Linear(C//r -> C).weight.T

    # 1) Small batch, default lane-dense flattened path (single grid step).
    x = jax.random.normal(kx, (2, C, L), dtype=jnp.float32)
    out = jax.block_until_ready(se_block(x, w1, w2))
    ref = se_block_reference(x, w1, w2)
    assert out.shape == x.shape
    assert jnp.allclose(out, ref, atol=1e-5, rtol=1e-5), "flat path mismatch vs reference"

    # 2) Batch-tiled grid with a non-divisible batch (partial final block).
    xb = jax.random.normal(kx2, (20, C, L), dtype=jnp.float32)
    out_b = jax.block_until_ready(se_block(xb, w1, w2, block_b=8))
    ref_b = se_block_reference(xb, w1, w2)
    assert jnp.allclose(out_b, ref_b, atol=1e-5, rtol=1e-5), "tiled flat path mismatch"

    # 3) Fallback native-NCL kernel (used when the one-hot matrices would be
    #    too large for VMEM); forced here so the path stays covered.
    out_n = jax.block_until_ready(se_block(x, w1, w2, force_ncl=True, block_b=1))
    assert jnp.allclose(out_n, ref, atol=1e-5, rtol=1e-5), "NCL fallback mismatch"

    print("KERNEL_OK")
</pallas_src>

<mosaic_0001>
module attributes {stable_mosaic.version = 11 : i64} {
  func.func @_se_flat_kernel(%arg0: i32, %arg1: memref<2x1024xf32, #tpu.memory_space<vmem>>, %arg2: memref<64x4xf32, #tpu.memory_space<vmem>>, %arg3: memref<4x64xf32, #tpu.memory_space<vmem>>, %arg4: memref<1024x64xf32, #tpu.memory_space<vmem>>, %arg5: memref<64x1024xf32, #tpu.memory_space<vmem>>, %arg6: memref<2x1024xf32, #tpu.memory_space<vmem>>) attributes {dimension_semantics = [#tpu.dimension_semantics<parallel>], iteration_bounds = array<i64: 1>, scalar_prefetch = 0 : i64, scratch_operands = 0 : i64, tpu.core_type = #tpu.core_type<tc>, window_params = [{transform_indices = @transform_0, window_bounds = array<i64: 2, 1024>}, {pipeline_mode = #tpu.pipeline_mode<synchronous>, transform_indices = @transform_1, window_bounds = array<i64: 64, 4>}, {pipeline_mode = #tpu.pipeline_mode<synchronous>, transform_indices = @transform_2, window_bounds = array<i64: 4, 64>}, {pipeline_mode = #tpu.pipeline_mode<synchronous>, transform_indices = @transform_3, window_bounds = array<i64: 1024, 64>}, {pipeline_mode = #tpu.pipeline_mode<synchronous>, transform_indices = @transform_4, window_bounds = array<i64: 64, 1024>}, {transform_indices = @transform_5, window_bounds = array<i64: 2, 1024>}]} {
    %c0 = arith.constant 0 : index
    %c0_0 = arith.constant 0 : index
    %0 = vector.load %arg1[%c0, %c0_0] : memref<2x1024xf32, #tpu.memory_space<vmem>>, vector<2x1024xf32>
    %c0_1 = arith.constant 0 : index
    %c0_2 = arith.constant 0 : index
    %1 = vector.load %arg4[%c0_1, %c0_2] : memref<1024x64xf32, #tpu.memory_space<vmem>>, vector<1024x64xf32>
    %cst = arith.constant dense<0.000000e+00> : vector<2x64xf32>
    %2 = tpu.matmul %0, %1, %cst {dimension_numbers = #tpu.dot_dimension_numbers<[1], [0], [0], [1], [0, 0, 1, 1], [], []>} : vector<2x1024xf32>, vector<1024x64xf32>, vector<2x64xf32> -> vector<2x64xf32>
    %cst_3 = arith.constant 6.250000e-02 : f32
    %3 = vector.broadcast %cst_3 : f32 to vector<2x64xf32>
    %4 = arith.mulf %2, %3 : vector<2x64xf32>
    %c0_4 = arith.constant 0 : index
    %c0_5 = arith.constant 0 : index
    %5 = vector.load %arg2[%c0_4, %c0_5] : memref<64x4xf32, #tpu.memory_space<vmem>>, vector<64x4xf32>
    %cst_6 = arith.constant dense<0.000000e+00> : vector<2x4xf32>
    %6 = tpu.matmul %4, %5, %cst_6 {dimension_numbers = #tpu.dot_dimension_numbers<[1], [0], [0], [1], [0, 0, 1, 1], [], []>} : vector<2x64xf32>, vector<64x4xf32>, vector<2x4xf32> -> vector<2x4xf32>
    %cst_7 = arith.constant 0.000000e+00 : f32
    %7 = vector.broadcast %cst_7 : f32 to vector<2x4xf32>
    %8 = arith.maximumf %6, %7 : vector<2x4xf32>
    %c0_8 = arith.constant 0 : index
    %c0_9 = arith.constant 0 : index
    %9 = vector.load %arg3[%c0_8, %c0_9] : memref<4x64xf32, #tpu.memory_space<vmem>>, vector<4x64xf32>
    %cst_10 = arith.constant dense<0.000000e+00> : vector<2x64xf32>
    %10 = tpu.matmul %8, %9, %cst_10 {dimension_numbers = #tpu.dot_dimension_numbers<[1], [0], [0], [1], [0, 0, 1, 1], [], []>} : vector<2x4xf32>, vector<4x64xf32>, vector<2x64xf32> -> vector<2x64xf32>
    %cst_11 = arith.constant 0.000000e+00 : f32
    %11 = vector.broadcast %cst_11 : f32 to vector<2x64xf32>
    %12 = arith.subf %11, %10 : vector<2x64xf32>
    %13 = math.exp %12 : vector<2x64xf32>
    %cst_12 = arith.constant 1.000000e+00 : f32
    %14 = vector.broadcast %cst_12 : f32 to vector<2x64xf32>
    %15 = arith.addf %14, %13 : vector<2x64xf32>
    %cst_13 = arith.constant 1.000000e+00 : f32
    %16 = vector.broadcast %cst_13 : f32 to vector<2x64xf32>
    %17 = arith.divf %16, %15 : vector<2x64xf32>
    %c0_14 = arith.constant 0 : index
    %c0_15 = arith.constant 0 : index
    %18 = vector.load %arg5[%c0_14, %c0_15] : memref<64x1024xf32, #tpu.memory_space<vmem>>, vector<64x1024xf32>
    %cst_16 = arith.constant dense<0.000000e+00> : vector<2x1024xf32>
    %19 = tpu.matmul %17, %18, %cst_16 {dimension_numbers = #tpu.dot_dimension_numbers<[1], [0], [0], [1], [0, 0, 1, 1], [], []>} : vector<2x64xf32>, vector<64x1024xf32>, vector<2x1024xf32> -> vector<2x1024xf32>
    %20 = arith.mulf %0, %19 : vector<2x1024xf32>
    %c0_17 = arith.constant 0 : index
    %c0_18 = arith.constant 0 : index
    %21 = vector.load %arg6[%c0_17, %c0_18] : memref<2x1024xf32, #tpu.memory_space<vmem>>, vector<2x1024xf32>
    tpu.vector_store %arg6[%c0_17, %c0_18], %20 {strides = array<i32>} : memref<2x1024xf32, #tpu.memory_space<vmem>>, vector<2x1024xf32>,
    return
  }
  func.func @transform_0(%arg0: i32) -> (i32, i32) {
    %c0_i32 = arith.constant 0 : i32
    %c0_i32_0 = arith.constant 0 : i32
    return %arg0, %c0_i32 : i32, i32
  }
  func.func @transform_1(%arg0: i32) -> (i32, i32) {
    %c0_i32 = arith.constant 0 : i32
    %c0_i32_0 = arith.constant 0 : i32
    %c0_i32_1 = arith.constant 0 : i32
    return %c0_i32, %c0_i32_0 : i32, i32
  }
  func.func @transform_2(%arg0: i32) -> (i32, i32) {
    %c0_i32 = arith.constant 0 : i32
    %c0_i32_0 = arith.constant 0 : i32
    %c0_i32_1 = arith.constant 0 : i32
    return %c0_i32, %c0_i32_0 : i32, i32
  }
  func.func @transform_3(%arg0: i32) -> (i32, i32) {
    %c0_i32 = arith.constant 0 : i32
    %c0_i32_0 = arith.constant 0 : i32
    %c0_i32_1 = arith.constant 0 : i32
    return %c0_i32, %c0_i32_0 : i32, i32
  }
  func.func @transform_4(%arg0: i32) -> (i32, i32) {
    %c0_i32 = arith.constant 0 : i32
    %c0_i32_0 = arith.constant 0 : i32
    %c0_i32_1 = arith.constant 0 : i32
    return %c0_i32, %c0_i32_0 : i32, i32
  }
  func.func @transform_5(%arg0: i32) -> (i32, i32) {
    %c0_i32 = arith.constant 0 : i32
    %c0_i32_0 = arith.constant 0 : i32
    return %arg0, %c0_i32 : i32, i32
  }
}

</mosaic_0001>

<bundles_post_ra>
// kernel: tpu_custom_call.1
= control target key start
LH: loop header
LB: loop body
LE: loop exit
PB: predicated region body
PF: predicated region fallthrough
CT: control target
= control target key end

     0   :  { %v1478_v47 = vmov 1983009808   ;;  %v157_v49 = vlaneseq  ;;  %s2173_s0 = inlined_call_operand.vmem [shape: f32[2,1024], index: 0, kind: input, shape index: {}]   ;;  %s2174_s1 = inlined_call_operand.vmem [shape: f32[64,4], index: 1, kind: input, shape index: {}]   ;;  %s2175_s2 = inlined_call_operand.vmem [shape: f32[4,64], index: 2, kind: input, shape index: {}]   ;;  %s2176_s3 = inlined_call_operand.vmem [shape: f32[1024,64], index: 3, kind: input, shape index: {}]   ;;  %s2177_s4 = inlined_call_operand.vmem [shape: f32[64,1024], index: 4, kind: input, shape index: {}]   ;;  %s2178_s5 = inlined_call_operand.hbm [shape: f32[2,1024], index: 5, kind: output, shape index: {}]  }
   0x1   :  { %v39_v0 = vld [vmem:[%s2176_s3 + $0x80] sm:$0xff]  ;;  %v40_v1 = vld [vmem:[%s2176_s3 + $0x88] sm:$0xff]  ;;  %v41_v11 = vld [vmem:[%s2176_s3 + $0x90] sm:$0xff]  ;;  %v155_v48 = vunpack.c.l.s4 %v1478_v47 }
   0x2   :  { %v71_v2 = vld [vmem:[%s2176_s3 + $0x180] sm:$0xff]  ;;  %v1239_v3 = vpack.c.bf16 %v40_v1, %v39_v0  ;;  %v72_v4 = vld [vmem:[%s2176_s3 + $0x188] sm:$0xff]  ;;  %v42_v13 = vld [vmem:[%s2176_s3 + $0x98] sm:$0xff]  ;;  %v158_v0 = vshrl.u32 %v157_v49, 7 }
   0x3   :  { %v23_v5 = vld [vmem:[%s2176_s3] sm:$0xff]  ;;  %v24_v6 = vld [vmem:[%s2176_s3 + $0x8] sm:$0xff]  ;;  %v1271_v7 = vpack.c.bf16 %v72_v4, %v71_v2  ;;  %v73_v14 = vld [vmem:[%s2176_s3 + $0x190] sm:$0xff]  ;;  %v1243_v16 = vpack.c.bf16 %v42_v13, %v41_v11  ;;  %v156_v63 = vunpack.c.0.s8 %v155_v48 }
   0x4   :  { %v1241_v8 = vpack.c.bf16 %v24_v6, %v23_v5  ;;  %v55_v9 = vld [vmem:[%s2176_s3 + $0x100] sm:$0xff]  ;;  %v56_v10 = vld [vmem:[%s2176_s3 + $0x108] sm:$0xff]  ;;  %1240 = vmatprep.subr.bf16.mxu0 %v1239_v3  ;;  %v74_v15 = vld [vmem:[%s2176_s3 + $0x198] sm:$0xff] }
   0x5   :  { %v1273_v12 = vpack.c.bf16 %v56_v10, %v55_v9  ;;  %1272 = vmatprep.subr.bf16.mxu1 %v1271_v7  ;;  %v1275_v17 = vpack.c.bf16 %v74_v15, %v73_v14  ;;  %v25_v18 = vld [vmem:[%s2176_s3 + $0x10] sm:$0xff]  ;;  %v26_v19 = vld [vmem:[%s2176_s3 + $0x18] sm:$0xff]  ;;  %v43_v23 = vld [vmem:[%s2176_s3 + $0xa0] sm:$0xff]  ;;  %v1663_v13 = vsub.s32 %v156_v63, %v158_v0 }
   0x6   :  { %1242 = vmatpush3.bf16.msra.mxu0 %v1241_v8  ;;  %v57_v20 = vld [vmem:[%s2176_s3 + $0x110] sm:$0xff]  ;;  %v1245_v21 = vpack.c.bf16 %v26_v19, %v25_v18  ;;  %v58_v22 = vld [vmem:[%s2176_s3 + $0x118] sm:$0xff]  ;;  %v44_v24 = vld [vmem:[%s2176_s3 + $0xa8] sm:$0xff] }
   0x7   :  { %1274 = vmatpush3.bf16.msra.mxu1 %v1273_v12  ;;  %1244 = vmatprep.subr.bf16.mxu0 %v1243_v16  ;;  %v1277_v25 = vpack.c.bf16 %v58_v22, %v57_v20  ;;  %v1247_v26 = vpack.c.bf16 %v44_v24, %v43_v23  ;;  %v75_v27 = vld [vmem:[%s2176_s3 + $0x1a0] sm:$0xff]  ;;  %v76_v28 = vld [vmem:[%s2176_s3 + $0x1a8] sm:$0xff]  ;;  %v45_v35 = vld [vmem:[%s2176_s3 + $0xb0] sm:$0xff] }
   0x8   :  { %1276 = vmatprep.subr.bf16.mxu1 %v1275_v17  ;;  %v27_v29 = vld [vmem:[%s2176_s3 + $0x20] sm:$0xff]  ;;  %v1279_v30 = vpack.c.bf16 %v76_v28, %v75_v27  ;;  %v28_v31 = vld [vmem:[%s2176_s3 + $0x28] sm:$0xff]  ;;  %v46_v36 = vld [vmem:[%s2176_s3 + $0xb8] sm:$0xff] }
   0x9   :  { %v59_v32 = vld [vmem:[%s2176_s3 + $0x120] sm:$0xff]  ;;  %v60_v33 = vld [vmem:[%s2176_s3 + $0x128] sm:$0xff]  ;;  %v1249_v34 = vpack.c.bf16 %v28_v31, %v27_v29  ;;  %v77_v37 = vld [vmem:[%s2176_s3 + $0x1b0] sm:$0xff]  ;;  %v1251_v39 = vpack.c.bf16 %v46_v36, %v45_v35 }
   0xa   :  { %1246 = vmatpush3.bf16.msra.mxu0 %v1245_v21  ;;  %v1281_v38 = vpack.c.bf16 %v60_v33, %v59_v32  ;;  %v78_v40 = vld [vmem:[%s2176_s3 + $0x1b8] sm:$0xff]  ;;  %v29_v41 = vld [vmem:[%s2176_s3 + $0x30] sm:$0xff]  ;;  %v47_v46 = vld [vmem:[%s2176_s3 + $0xc0] sm:$0xff] }
   0xb   :  { %1278 = vmatpush3.bf16.msra.mxu1 %v1277_v25  ;;  %1248 = vmatprep.subr.bf16.mxu0 %v1247_v26  ;;  %v30_v42 = vld [vmem:[%s2176_s3 + $0x38] sm:$0xff]  ;;  %v1283_v43 = vpack.c.bf16 %v78_v40, %v77_v37  ;;  %v61_v44 = vld [vmem:[%s2176_s3 + $0x130] sm:$0xff]  ;;  %v48_v50 = vld [vmem:[%s2176_s3 + $0xc8] sm:$0xff] }
   0xc   :  { %1280 = vmatprep.subr.bf16.mxu1 %v1279_v30  ;;  %v62_v45 = vld [vmem:[%s2176_s3 + $0x138] sm:$0xff]  ;;  %v79_v51 = vld [vmem:[%s2176_s3 + $0x1c0] sm:$0xff]  ;;  %v80_v52 = vld [vmem:[%s2176_s3 + $0x1c8] sm:$0xff]  ;;  %v1253_v53 = vpack.c.bf16 %v30_v42, %v29_v41  ;;  %v1255_v55 = vpack.c.bf16 %v48_v50, %v47_v46 }
   0xd   :  { %v1285_v54 = vpack.c.bf16 %v62_v45, %v61_v44  ;;  %v31_v56 = vld [vmem:[%s2176_s3 + $0x40] sm:$0xff]  ;;  %v32_v57 = vld [vmem:[%s2176_s3 + $0x48] sm:$0xff]  ;;  %v1287_v59 = vpack.c.bf16 %v80_v52, %v79_v51  ;;  %v49_v61 = vld [vmem:[%s2176_s3 + $0xd0] sm:$0xff] }
   0xe   :  { %1250 = vmatpush3.bf16.msra.mxu0 %v1249_v34  ;;  %v63_v58 = vld [vmem:[%s2176_s3 + $0x140] sm:$0xff]  ;;  %v64_v60 = vld [vmem:[%s2176_s3 + $0x148] sm:$0xff]  ;;  %v50_v62 = vld [vmem:[%s2176_s3 + $0xd8] sm:$0xff]  ;;  %v1257_v3 = vpack.c.bf16 %v32_v57, %v31_v56 }
   0xf   :  { %1282 = vmatpush3.bf16.msra.mxu1 %v1281_v38  ;;  %1252 = vmatprep.subr.bf16.mxu0 %v1251_v39  ;;  %v81_v1 = vld [vmem:[%s2176_s3 + $0x1d0] sm:$0xff]  ;;  %v82_v2 = vld [vmem:[%s2176_s3 + $0x1d8] sm:$0xff]  ;;  %v1289_v4 = vpack.c.bf16 %v64_v60, %v63_v58  ;;  %v1259_v5 = vpack.c.bf16 %v50_v62, %v49_v61  ;;  %v51_v11 = vld [vmem:[%s2176_s3 + $0xe0] sm:$0xff] }
  0x10   :  { %1284 = vmatprep.subr.bf16.mxu1 %v1283_v43  ;;  %v33_v6 = vld [vmem:[%s2176_s3 + $0x50] sm:$0xff]  ;;  %v34_v7 = vld [vmem:[%s2176_s3 + $0x58] sm:$0xff]  ;;  %v1291_v9 = vpack.c.bf16 %v82_v2, %v81_v1  ;;  %v52_v12 = vld [vmem:[%s2176_s3 + $0xe8] sm:$0xff] }
  0x11   :  { %v65_v8 = vld [vmem:[%s2176_s3 + $0x150] sm:$0xff]  ;;  %v66_v10 = vld [vmem:[%s2176_s3 + $0x158] sm:$0xff]  ;;  %v83_v14 = vld [vmem:[%s2176_s3 + $0x1e0] sm:$0xff]  ;;  %v1261_v16 = vpack.c.bf16 %v34_v7, %v33_v6  ;;  %v1263_v19 = vpack.c.bf16 %v52_v12, %v51_v11 }
  0x12   :  { %1254 = vmatpush3.bf16.msra.mxu0 %v1253_v53  ;;  %v84_v15 = vld [vmem:[%s2176_s3 + $0x1e8] sm:$0xff]  ;;  %v35_v17 = vld [vmem:[%s2176_s3 + $0x60] sm:$0xff]  ;;  %v1293_v18 = vpack.c.bf16 %v66_v10, %v65_v8  ;;  %v53_v25 = vld [vmem:[%s2176_s3 + $0xf0] sm:$0xff] }
  0x13   :  { %1286 = vmatpush3.bf16.msra.mxu1 %v1285_v54  ;;  %1256 = vmatprep.subr.bf16.mxu0 %v1255_v55  ;;  %v36_v20 = vld [vmem:[%s2176_s3 + $0x68] sm:$0xff]  ;;  %v67_v21 = vld [vmem:[%s2176_s3 + $0x160] sm:$0xff]  ;;  %v1295_v23 = vpack.c.bf16 %v84_v15, %v83_v14  ;;  %v54_v26 = vld [vmem:[%s2176_s3 + $0xf8] sm:$0xff] }
  0x14   :  { %1288 = vmatprep.subr.bf16.mxu1 %v1287_v59  ;;  %v1683_v22 = vld [vmem:[%s2173_s0] sm:$0xff]  ;;  %v68_v24 = vld [vmem:[%s2176_s3 + $0x168] sm:$0xff]  ;;  %v85_v29 = vld [vmem:[%s2176_s3 + $0x1f0] sm:$0xff]  ;;  %v1265_v31 = vpack.c.bf16 %v36_v20, %v35_v17  ;;  %v1267_v35 = vpack.c.bf16 %v54_v26, %v53_v25 }
  0x15   :  { %v160_v27 = vrot.slane %v1683_v22, %v1663_v13  ;;  %v153_v28 = vcombine.high %v1683_v22, %v1683_v22  ;;  %v86_v30 = vld [vmem:[%s2176_s3 + $0x1f8] sm:$0xff]  ;;  %v1297_v34 = vpack.c.bf16 %v68_v24, %v67_v21  ;;  %v37_v36 = vld [vmem:[%s2176_s3 + $0x70] sm:$0xff]  ;;  %v103_v42 = vld [vmem:[%s2176_s3 + $0x280] sm:$0xff] }
  0x16   :  { %1258 = vmatpush3.bf16.msra.mxu0 %v1257_v3  ;;  %v38_v37 = vld [vmem:[%s2176_s3 + $0x78] sm:$0xff]  ;;  %v69_v38 = vld [vmem:[%s2176_s3 + $0x170] sm:$0xff]  ;;  %v1299_v39 = vpack.c.bf16 %v86_v30, %v85_v29  ;;  %v104_v43 = vld [vmem:[%s2176_s3 + $0x288] sm:$0xff] }
  0x17   :  { %1290 = vmatpush3.bf16.msra.mxu1 %v1289_v4  ;;  %1260 = vmatprep.subr.bf16.mxu0 %v1259_v5  ;;  %v168_v32 = vcombine.high %v160_v27, %v160_v27  ;;  %v167_v33 = vrot.slane %v153_v28, %v1663_v13  ;;  %v70_v40 = vld [vmem:[%s2176_s3 + $0x178] sm:$0xff]  ;;  %v135_v44 = vld [vmem:[%s2176_s3 + $0x380] sm:$0xff]  ;;  %v136_v45 = vld [vmem:[%s2176_s3 + $0x388] sm:$0xff]  ;;  %v1269_v46 = vpack.c.bf16 %v38_v37, %v37_v36 }
  0x18   :  { %1292 = vmatprep.subr.bf16.mxu1 %v1291_v9  ;;  %v1301_v47 = vpack.c.bf16 %v70_v40, %v69_v38  ;;  %v1303_v48 = vpack.c.bf16 %v104_v43, %v103_v42  ;;  %v87_v49 = vld [vmem:[%s2176_s3 + $0x200] sm:$0xff]  ;;  %v88_v50 = vld [vmem:[%s2176_s3 + $0x208] sm:$0xff]  ;;  %v1335_v52 = vpack.c.bf16 %v136_v45, %v135_v44  ;;  %v105_v54 = vld [vmem:[%s2176_s3 + $0x290] sm:$0xff] }
  0x19   :  { %259 = vmatprep.mubr.f32.mxu0 %v168_v32  ;;  %v169_v41 = vcombine.high %v167_v33, %v167_v33  ;;  %v119_v51 = vld [vmem:[%s2176_s3 + $0x300] sm:$0xff]  ;;  %v120_v53 = vld [vmem:[%s2176_s3 + $0x308] sm:$0xff]  ;;  %v106_v55 = vld [vmem:[%s2176_s3 + $0x298] sm:$0xff]  ;;  %v1305_v58 = vpack.c.bf16 %v88_v50, %v87_v49 }
  0x1a   :  { %1262 = vmatpush3.bf16.msra.mxu0 %v1261_v16  ;;  %v137_v56 = vld [vmem:[%s2176_s3 + $0x390] sm:$0xff]  ;;  %v138_v57 = vld [vmem:[%s2176_s3 + $0x398] sm:$0xff]  ;;  %v1337_v59 = vpack.c.bf16 %v120_v53, %v119_v51  ;;  %v1307_v60 = vpack.c.bf16 %v106_v55, %v105_v54  ;;  %v107_v2 = vld [vmem:[%s2176_s3 + $0x2a0] sm:$0xff] }
  0x1b   :  { %1294 = vmatpush3.bf16.msra.mxu1 %v1293_v18  ;;  %1264 = vmatprep.subr.bf16.mxu0 %v1263_v19  ;;  %v89_v61 = vld [vmem:[%s2176_s3 + $0x210] sm:$0xff]  ;;  %v90_v62 = vld [vmem:[%s2176_s3 + $0x218] sm:$0xff]  ;;  %v1339_v0 = vpack.c.bf16 %v138_v57, %v137_v56  ;;  %v108_v3 = vld [vmem:[%s2176_s3 + $0x2a8] sm:$0xff] }
  0x1c   :  { %1296 = vmatprep.subr.bf16.mxu1 %v1295_v23  ;;  %329 = vmatprep.mubr.f32.mxu1 %v169_v41  ;;  %v121_v63 = vld [vmem:[%s2176_s3 + $0x310] sm:$0xff]  ;;  %v122_v1 = vld [vmem:[%s2176_s3 + $0x318] sm:$0xff]  ;;  %v139_v4 = vld [vmem:[%s2176_s3 + $0x3a0] sm:$0xff]  ;;  %v1309_v6 = vpack.c.bf16 %v90_v62, %v89_v61  ;;  %v1311_v8 = vpack.c.bf16 %v108_v3, %v107_v2 }
  0x1d   :  { %v140_v5 = vld [vmem:[%s2176_s3 + $0x3a8] sm:$0xff]  ;;  %v1341_v7 = vpack.c.bf16 %v122_v1, %v121_v63  ;;  %v91_v9 = vld [vmem:[%s2176_s3 + $0x220] sm:$0xff]  ;;  %v109_v15 = vld [vmem:[%s2176_s3 + $0x2b0] sm:$0xff] }
  0x1e   :  { %1266 = vmatpush3.bf16.msra.mxu0 %v1265_v31  ;;  %v92_v10 = vld [vmem:[%s2176_s3 + $0x228] sm:$0xff]  ;;  %v123_v11 = vld [vmem:[%s2176_s3 + $0x320] sm:$0xff]  ;;  %v1343_v12 = vpack.c.bf16 %v140_v5, %v139_v4  ;;  %v110_v16 = vld [vmem:[%s2176_s3 + $0x2b8] sm:$0xff] }
  0x1f   :  { %1298 = vmatpush3.bf16.msra.mxu1 %v1297_v34  ;;  %1268 = vmatprep.subr.bf16.mxu0 %v1267_v35  ;;  %v124_v14 = vld [vmem:[%s2176_s3 + $0x328] sm:$0xff]  ;;  %v141_v17 = vld [vmem:[%s2176_s3 + $0x3b0] sm:$0xff]  ;;  %v142_v18 = vld [vmem:[%s2176_s3 + $0x3b8] sm:$0xff]  ;;  %v1313_v19 = vpack.c.bf16 %v92_v10, %v91_v9  ;;  %v1315_v23 = vpack.c.bf16 %v110_v16, %v109_v15 }
  0x20   :  { %1300 = vmatprep.subr.bf16.mxu1 %v1299_v39  ;;  %v93_v20 = vld [vmem:[%s2176_s3 + $0x230] sm:$0xff]  ;;  %v1345_v21 = vpack.c.bf16 %v124_v14, %v123_v11  ;;  %v94_v24 = vld [vmem:[%s2176_s3 + $0x238] sm:$0xff]  ;;  %v111_v28 = vld [vmem:[%s2176_s3 + $0x2c0] sm:$0xff] }
  0x21   :  { %v125_v25 = vld [vmem:[%s2176_s3 + $0x330] sm:$0xff]  ;;  %v126_v26 = vld [vmem:[%s2176_s3 + $0x338] sm:$0xff]  ;;  %v112_v29 = vld [vmem:[%s2176_s3 + $0x2c8] sm:$0xff] }
  0x22   :  { %1270 = vmatpush3.bf16.msra.mxu0 %v1269_v46  ;;  %v143_v30 = vld [vmem:[%s2176_s3 + $0x3c0] sm:$0xff]  ;;  %v144_v31 = vld [vmem:[%s2176_s3 + $0x3c8] sm:$0xff] }
  0x23   :  { %1302 = vmatpush3.bf16.msra.mxu1 %v1301_v47  ;;  %1304 = vmatprep.subr.bf16.mxu0 %v1303_v48  ;;  %v1828_v32 = vld [vmem:[%s2173_s0 + $0x8] sm:$0xff] }
  0x24   :  { %1336 = vmatprep.subr.bf16.mxu1 %v1335_v52 }
  0x25   :  { %260 = vmatmul.mubr.f32.vlgmr.msra.gmra.mrb[0].mxu0 %v160_v27  ;;  %v1347_v27 = vpack.c.bf16 %v142_v18, %v141_v17 }
  0x26   :  { %330 = vmatmul.mubr.f32.vlgmr.msra.gmra.mrb[0].mxu1 %v167_v33  ;;  %1306 = vmatpush3.bf16.msra.mxu0 %v1305_v58 }
  0x27   :  { %1338 = vmatpush3.bf16.msra.mxu1 %v1337_v59  ;;  %1308 = vmatprep.subr.bf16.mxu0 %v1307_v60 }
  0x28   :  { %1340 = vmatprep.subr.bf16.mxu1 %v1339_v0 }
  0x2a   :  { %1310 = vmatpush3.bf16.msra.mxu0 %v1309_v6 }
  0x2b   :  { %1342 = vmatpush3.bf16.msra.mxu1 %v1341_v7  ;;  %1312 = vmatprep.subr.bf16.mxu0 %v1311_v8 }
  0x2c   :  { %1344 = vmatprep.subr.bf16.mxu1 %v1343_v12 }
  0x2d   :  { %10 = vsyncpa [#allocation3], 0  ;;  %v1317_v33 = vpack.c.bf16 %v94_v24, %v93_v20  ;;  %v1832_v34 = vrot.slane %v1828_v32, %v1663_v13  ;;  %v170_v35 = vcombine.high %v1828_v32, %v1828_v32  ;;  %v1349_v36 = vpack.c.bf16 %v126_v26, %v125_v25  ;;  %v95_v38 = vld [vmem:[%s2176_s3 + $0x240] sm:$0xff]  ;;  %v96_v39 = vld [vmem:[%s2176_s3 + $0x248] sm:$0xff] }
  0x2e   :  { %1314 = vmatpush3.bf16.msra.mxu0 %v1313_v19  ;;  %v1319_v37 = vpack.c.bf16 %v112_v29, %v111_v28  ;;  %v127_v40 = vld [vmem:[%s2176_s3 + $0x340] sm:$0xff]  ;;  %v1351_v41 = vpack.c.bf16 %v144_v31, %v143_v30  ;;  %v128_v42 = vld [vmem:[%s2176_s3 + $0x348] sm:$0xff]  ;;  %v113_v43 = vld [vmem:[%s2176_s3 + $0x2d0] sm:$0xff]  ;;  %v1321_v49 = vpack.c.bf16 %v96_v39, %v95_v38  ;;  %v1479_v25 = vmov 0.0|0.0  }
  0x2f   :  { %1346 = vmatpush3.bf16.msra.mxu1 %v1345_v21  ;;  %1316 = vmatprep.subr.bf16.mxu0 %v1315_v23  ;;  %v114_v44 = vld [vmem:[%s2176_s3 + $0x2d8] sm:$0xff]  ;;  %v185_v45 = vcombine.high %v1832_v34, %v1832_v34  ;;  %v184_v46 = vrot.slane %v170_v35, %v1663_v13  ;;  %v145_v47 = vld [vmem:[%s2176_s3 + $0x3d0] sm:$0xff]  ;;  %v1353_v51 = vpack.c.bf16 %v128_v42, %v127_v40  ;;  %v115_v58 = vld [vmem:[%s2176_s3 + $0x2e0] sm:$0xff]  ;;  %vm1480_vm0 = vmmov 0  }
  0x30   :  { %1348 = vmatprep.subr.bf16.mxu1 %v1347_v27  ;;  %v146_v48 = vld [vmem:[%s2176_s3 + $0x3d8] sm:$0xff]  ;;  %v1323_v52 = vpack.c.bf16 %v114_v44, %v113_v43  ;;  %v97_v53 = vld [vmem:[%s2176_s3 + $0x250] sm:$0xff]  ;;  %v116_v59 = vld [vmem:[%s2176_s3 + $0x2e8] sm:$0xff]  ;;  %vm564_vm1 = vcmask 1043456   ;;  %vm484_vm2 = vcmask 523264   ;;  %vm560_vm3 = vcmask 31744  }
  0x31   :  { %399 = vmatprep.mubr.f32.mxu0 %v185_v45  ;;  %v186_v50 = vcombine.high %v184_v46, %v184_v46  ;;  %v98_v54 = vld [vmem:[%s2176_s3 + $0x258] sm:$0xff]  ;;  %v129_v55 = vld [vmem:[%s2176_s3 + $0x350] sm:$0xff]  ;;  %v1355_v56 = vpack.c.bf16 %v146_v48, %v145_v47  ;;  %v147_v60 = vld [vmem:[%s2176_s3 + $0x3e0] sm:$0xff]  ;;  %v1327_v0 = vpack.c.bf16 %v116_v59, %v115_v58 }
  0x32   :  { %1318 = vmatpush3.bf16.msra.mxu0 %v1317_v33  ;;  %v130_v57 = vld [vmem:[%s2176_s3 + $0x358] sm:$0xff]  ;;  %v148_v61 = vld [vmem:[%s2176_s3 + $0x3e8] sm:$0xff]  ;;  %v1325_v62 = vpack.c.bf16 %v98_v54, %v97_v53  ;;  %v99_v1 = vld [vmem:[%s2176_s3 + $0x260] sm:$0xff] }
  0x33   :  { %1350 = vmatpush3.bf16.msra.mxu1 %v1349_v36  ;;  %1320 = vmatprep.subr.bf16.mxu0 %v1319_v37  ;;  %v1357_v63 = vpack.c.bf16 %v130_v57, %v129_v55  ;;  %v100_v2 = vld [vmem:[%s2176_s3 + $0x268] sm:$0xff]  ;;  %v131_v3 = vld [vmem:[%s2176_s3 + $0x360] sm:$0xff]  ;;  %v1359_v4 = vpack.c.bf16 %v148_v61, %v147_v60  ;;  %v117_v6 = vld [vmem:[%s2176_s3 + $0x2f0] sm:$0xff]  ;;  %v1481_v36 = vmov 0.0  }
  0x34   :  { %1352 = vmatprep.subr.bf16.mxu1 %v1351_v41  ;;  %469 = vmatprep.mubr.f32.mxu1 %v186_v50  ;;  %v132_v5 = vld [vmem:[%s2176_s3 + $0x368] sm:$0xff]  ;;  %v118_v7 = vld [vmem:[%s2176_s3 + $0x2f8] sm:$0xff]  ;;  %v149_v8 = vld [vmem:[%s2176_s3 + $0x3f0] sm:$0xff]  ;;  %v1329_v10 = vpack.c.bf16 %v100_v2, %v99_v1 }
  0x35   :  { %v150_v9 = vld [vmem:[%s2176_s3 + $0x3f8] sm:$0xff]  ;;  %v1361_v11 = vpack.c.bf16 %v132_v5, %v131_v3  ;;  %v1331_v12 = vpack.c.bf16 %v118_v7, %v117_v6  ;;  %v101_v14 = vld [vmem:[%s2176_s3 + $0x270] sm:$0xff]  ;;  %v476_v21 = vld [vmem:[%s2174_s1] sm:$0xff] }
  0x36   :  { %1322 = vmatpush3.bf16.msra.mxu0 %v1321_v49  ;;  %v102_v15 = vld [vmem:[%s2176_s3 + $0x278] sm:$0xff]  ;;  %v1363_v16 = vpack.c.bf16 %v150_v9, %v149_v8  ;;  %v133_v17 = vld [vmem:[%s2176_s3 + $0x370] sm:$0xff]  ;;  %v477_v23 = vld [vmem:[%s2174_s1 + $0x8] sm:$0xff] }
  0x37   :  { %1354 = vmatpush3.bf16.msra.mxu1 %v1353_v51  ;;  %1324 = vmatprep.subr.bf16.mxu0 %v1323_v52  ;;  %v134_v18 = vld [vmem:[%s2176_s3 + $0x378] sm:$0xff]  ;;  %v1333_v19 = vpack.c.bf16 %v102_v15, %v101_v14  ;;  %v478_v24 = vld [vmem:[%s2174_s1 + $0x10] sm:$0xff]  ;;  %v1368_v26 = vpack.c.bf16 %v477_v23, %v476_v21  ;;  %v480_v29 = vld [vmem:[%s2174_s1 + $0x20] sm:$0xff] }
  0x38   :  { %1356 = vmatprep.subr.bf16.mxu1 %v1355_v56  ;;  %v1365_v20 = vpack.c.bf16 %v134_v18, %v133_v17  ;;  %v479_v27 = vld [vmem:[%s2174_s1 + $0x18] sm:$0xff]  ;;  %v481_v30 = vld [vmem:[%s2174_s1 + $0x28] sm:$0xff]  ;;  %v482_v33 = vld [vmem:[%s2174_s1 + $0x30] sm:$0xff] }
  0x39   :  { %v1371_v28 = vpack.c.bf16 %v479_v27, %v478_v24  ;;  %v1374_v31 = vpack.c.bf16 %v481_v30, %v480_v29  ;;  %v559_v37 = vld [vmem:[%s2175_s2] sm:$0xf]  ;;  %v645_v57 = vld [vmem:[%s2177_s4 + $0x8] sm:$0xff]  ;;  %v647_v59 = vld [vmem:[%s2177_s4 + $0x18] sm:$0xff] }
  0x3a   :  { %1326 = vmatpush3.bf16.msra.mxu0 %v1325_v62  ;;  %v653_v58 = vld [vmem:[%s2177_s4 + $0x48] sm:$0xff]  ;;  %v655_v61 = vld [vmem:[%s2177_s4 + $0x58] sm:$0xff]  ;;  %v644_v62 = vld [vmem:[%s2177_s4] sm:$0xff] }
  0x3b   :  { %1358 = vmatpush3.bf16.msra.mxu1 %v1357_v63  ;;  %1328 = vmatprep.subr.bf16.mxu0 %v1327_v0  ;;  %v1379_v60 = vpack.c.bf16 %v653_v58, %v645_v57  ;;  %v652_v63 = vld [vmem:[%s2177_s4 + $0x40] sm:$0xff]  ;;  %v1395_v0 = vpack.c.bf16 %v655_v61, %v647_v59  ;;  %v646_v2 = vld [vmem:[%s2177_s4 + $0x10] sm:$0xff]  ;;  %v661_v5 = vld [vmem:[%s2177_s4 + $0x88] sm:$0xff] }
  0x3c   :  { %1360 = vmatprep.subr.bf16.mxu1 %v1359_v4  ;;  %v1381_v1 = vpack.c.bf16 %v652_v63, %v644_v62  ;;  %v654_v3 = vld [vmem:[%s2177_s4 + $0x50] sm:$0xff]  ;;  %v669_v6 = vld [vmem:[%s2177_s4 + $0xc8] sm:$0xff]  ;;  %v663_v7 = vld [vmem:[%s2177_s4 + $0x98] sm:$0xff] }
  0x3d   :  { %v1397_v4 = vpack.c.bf16 %v654_v3, %v646_v2  ;;  %v1383_v8 = vpack.c.bf16 %v669_v6, %v661_v5  ;;  %v671_v9 = vld [vmem:[%s2177_s4 + $0xd8] sm:$0xff]  ;;  %v662_v15 = vld [vmem:[%s2177_s4 + $0x90] sm:$0xff]  ;;  %v677_v18 = vld [vmem:[%s2177_s4 + $0x108] sm:$0xff] }
  0x3e   :  { %1330 = vmatpush3.bf16.msra.mxu0 %v1329_v10  ;;  %v660_v10 = vld [vmem:[%s2177_s4 + $0x80] sm:$0xff]  ;;  %v687_v23 = vld [vmem:[%s2177_s4 + $0x158] sm:$0xff]  ;;  %v686_v29 = vld [vmem:[%s2177_s4 + $0x150] sm:$0xff] }
  0x3f   :  { %1362 = vmatpush3.bf16.msra.mxu1 %v1361_v11  ;;  %1332 = vmatprep.subr.bf16.mxu0 %v1331_v12  ;;  %v668_v11 = vld [vmem:[%s2177_s4 + $0xc0] sm:$0xff]  ;;  %v1399_v12 = vpack.c.bf16 %v671_v9, %v663_v7  ;;  %v693_v30 = vld [vmem:[%s2177_s4 + $0x188] sm:$0xff]  ;;  %v650_v59 = vld [vmem:[%s2177_s4 + $0x30] sm:$0xff] }
  0x40   :  { %1364 = vmatprep.subr.bf16.mxu1 %v1363_v16  ;;  %v1385_v14 = vpack.c.bf16 %v668_v11, %v660_v10  ;;  %v670_v16 = vld [vmem:[%s2177_s4 + $0xd0] sm:$0xff]  ;;  %v676_v24 = vld [vmem:[%s2177_s4 + $0x100] sm:$0xff]  ;;  %v665_v61 = vld [vmem:[%s2177_s4 + $0xa8] sm:$0xff] }
  0x41   :  { %v1401_v17 = vpack.c.bf16 %v670_v16, %v662_v15  ;;  %v648_v57 = vld [vmem:[%s2177_s4 + $0x20] sm:$0xff]  ;;  %v673_v62 = vld [vmem:[%s2177_s4 + $0xe8] sm:$0xff]  ;;  %v667_v63 = vld [vmem:[%s2177_s4 + $0xb8] sm:$0xff] }
  0x42   :  { %1334 = vmatpush3.bf16.msra.mxu0 %v1333_v19  ;;  %v685_v19 = vld [vmem:[%s2177_s4 + $0x148] sm:$0xff]  ;;  %v656_v58 = vld [vmem:[%s2177_s4 + $0x60] sm:$0xff]  ;;  %v1415_v5 = vpack.c.bf16 %v673_v62, %v665_v61  ;;  %v666_v7 = vld [vmem:[%s2177_s4 + $0xb0] sm:$0xff] }
  0x43   :  { %1366 = vmatpush3.bf16.msra.mxu1 %v1365_v20  ;;  %1367 = vmatprep.subr.bf16.mxu0 %v1479_v25  ;;  %v679_v20 = vld [vmem:[%s2177_s4 + $0x118] sm:$0xff]  ;;  %v1387_v21 = vpack.c.bf16 %v685_v19, %v677_v18  ;;  %v664_v3 = vld [vmem:[%s2177_s4 + $0xa0] sm:$0xff]  ;;  %v681_v9 = vld [vmem:[%s2177_s4 + $0x128] sm:$0xff] }
  0x44   :  { %1234 = vmatprep.subr.mxu1 %v1481_v36  ;;  %v689_v11 = vld [vmem:[%s2177_s4 + $0x168] sm:$0xff]  ;;  %v688_v18 = vld [vmem:[%s2177_s4 + $0x160] sm:$0xff] }
  0x45   :  { %400 = vmatmul.mubr.f32.vlgmr.msra.gmra.mrb[2].mxu0 %v1832_v34  ;;  %v483_v34 = vld [vmem:[%s2174_s1 + $0x38] sm:$0xff]  ;;  %v1419_v19 = vpack.c.bf16 %v689_v11, %v681_v9 }
  0x46   :  { %470 = vmatmul.mubr.f32.vlgmr.msra.gmra.mrb[2].mxu1 %v184_v46  ;;  %1369 = vmatpush3.bf16.msra.mxu0 %v1368_v26  ;;  %v1377_v35 = vpack.c.bf16 %v483_v34, %v482_v33  ;;  %v1403_v26 = vpack.c.bf16 %v687_v23, %v679_v20  ;;  %v701_v33 = vld [vmem:[%s2177_s4 + $0x1c8] sm:$0xff]  ;;  %v695_v34 = vld [vmem:[%s2177_s4 + $0x198] sm:$0xff]  ;;  %v690_v23 = vld [vmem:[%s2177_s4 + $0x170] sm:$0xff] }
  0x47   :  { %1370 = vmatprep.subr.bf16.mxu0 %v1479_v25  ;;  %1231 = vmatprep.mubr.msk.f32.mxu0 %vm1480_vm0, %v1481_v36 }
  0x48   :  { %1236 = vmatprep.mubr.msk.f32.mxu1 %vm1480_vm0, %v1481_v36  ;;  %1235 = vmatpush3.msk.msra.mxu1 %vm564_vm1, %v559_v37  ;;  %v1391_v37 = vpack.c.bf16 %v701_v33, %v693_v30  ;;  %v696_v30 = vld [vmem:[%s2177_s4 + $0x1a0] sm:$0xff] }
  0x49   :  { %1380 = vmatprep.subr.bf16.mxu1 %v1379_v60  ;;  %v658_v60 = vld [vmem:[%s2177_s4 + $0x70] sm:$0xff] }
  0x4a   :  { %1372 = vmatpush3.bf16.msra.mxu0 %v1371_v28  ;;  %v678_v28 = vld [vmem:[%s2177_s4 + $0x110] sm:$0xff]  ;;  %v1429_v2 = vpack.c.bf16 %v658_v60, %v650_v59 }
  0x4b   :  { %1373 = vmatprep.subr.bf16.mxu0 %v1479_v25 }
  0x4e   :  { %1375 = vmatpush3.bf16.msra.mxu0 %v1374_v31  ;;  %v1405_v31 = vpack.c.bf16 %v686_v29, %v678_v28 }
  0x4f   :  { %1376 = vmatprep.subr.bf16.mxu0 %v1479_v25  ;;  %v684_v25 = vld [vmem:[%s2177_s4 + $0x140] sm:$0xff] }
  0x50   :  { %v1389_v27 = vpack.c.bf16 %v684_v25, %v676_v24  ;;  %v697_v24 = vld [vmem:[%s2177_s4 + $0x1a8] sm:$0xff] }
  0x51   :  { %v705_v25 = vld [vmem:[%s2177_s4 + $0x1e8] sm:$0xff] }
  0x52   :  { %1378 = vmatpush3.bf16.msra.mxu0 %v1377_v35  ;;  %v703_v35 = vld [vmem:[%s2177_s4 + $0x1d8] sm:$0xff] }
  0x53   :  { %1396 = vmatprep.subr.bf16.mxu0 %v1395_v0  ;;  %v675_v0 = vld [vmem:[%s2177_s4 + $0xf8] sm:$0xff] }
  0x54   :  { %v1431_v6 = vpack.c.bf16 %v675_v0, %v667_v63 }
  0xf8   :  { %v1096_v38 = vpop.f32.mrb[0].mxu0 }
  0xf9   :  { %v1131_v39 = vpop.f32.mrb[0].mxu1  ;;  %v1097_v40 = vpop.f32.mrb[1].mxu0 }
  0xfa   :  { %v1098_v41 = vadd.f32 %v1097_v40, %v1096_v38  ;;  %v1132_v42 = vpop.f32.mrb[1].mxu1  ;;  %v1407_v38 = vpack.c.bf16 %v703_v35, %v695_v34  ;;  %v700_v40 = vld [vmem:[%s2177_s4 + $0x1c0] sm:$0xff]  ;;  %v706_v35 = vld [vmem:[%s2177_s4 + $0x1f0] sm:$0xff] }
  0xfb   :  { %v1133_v43 = vadd.f32 %v1132_v42, %v1131_v39  ;;  %v692_v39 = vld [vmem:[%s2177_s4 + $0x180] sm:$0xff] }
  0xfc   :  { %v1393_v42 = vpack.c.bf16 %v700_v40, %v692_v39  ;;  %v704_v34 = vld [vmem:[%s2177_s4 + $0x1e0] sm:$0xff] }
  0xfd   :  { %v332_v44 = vadd.f32 %v1133_v43, %v1098_v41  ;;  %v694_v41 = vld [vmem:[%s2177_s4 + $0x190] sm:$0xff] }
  0xfe   :  { %v702_v43 = vld [vmem:[%s2177_s4 + $0x1d0] sm:$0xff] }
 0x118   :  { %v1166_v45 = vpop.f32.mrb[2].mxu0 }
 0x119   :  { %v1167_v46 = vpop.f32.mrb[3].mxu0  ;;  %v1201_v47 = vpop.f32.mrb[2].mxu1 }
 0x11a   :  { %v1168_v48 = vadd.f32 %v1167_v46, %v1166_v45  ;;  %v1202_v49 = vpop.f32.mrb[3].mxu1  ;;  %v657_v45 = vld [vmem:[%s2177_s4 + $0x68] sm:$0xff]  ;;  %v1409_v46 = vpack.c.bf16 %v702_v43, %v694_v41 }
 0x11b   :  { %v1203_v50 = vadd.f32 %v1202_v49, %v1201_v47  ;;  %v659_v49 = vld [vmem:[%s2177_s4 + $0x78] sm:$0xff] }
 0x11c   :  { %v402_v51 = vadd.f32 %v1168_v48, %v332_v44  ;;  %v649_v44 = vld [vmem:[%s2177_s4 + $0x28] sm:$0xff]  ;;  %v651_v48 = vld [vmem:[%s2177_s4 + $0x38] sm:$0xff] }
 0x11d   :  { %v1411_v47 = vpack.c.bf16 %v657_v45, %v649_v44 }
 0x11e   :  { %v472_v52 = vadd.f32 %v1203_v50, %v402_v51  ;;  %v1427_v50 = vpack.c.bf16 %v659_v49, %v651_v48 }
 0x120   :  { %v475_v53 = vmul.f32 0.0625, %v472_v52 }
 0x122   :  { %1232 = vmatmul.mubr.msk.f32.vlgmr.msra.gmra.mrb[4].mxu0 %vm484_vm2, %v475_v53 }
 0x123   :  { %846 = vmatprep.mubr.f32.mxu0 %v1481_v36  ;;  %1398 = vmatpush1.bf16.msra.mxu0 %v1397_v4  ;;  %v672_v4 = vld [vmem:[%s2177_s4 + $0xe0] sm:$0xff] }
 0x124   :  { %1400 = vmatprep.subr.bf16.mxu0 %v1399_v12  ;;  %v683_v12 = vld [vmem:[%s2177_s4 + $0x138] sm:$0xff]  ;;  %v1417_v15 = vpack.c.bf16 %v672_v4, %v664_v3 }
 0x127   :  { %1402 = vmatpush1.bf16.msra.mxu0 %v1401_v17  ;;  %v680_v17 = vld [vmem:[%s2177_s4 + $0x120] sm:$0xff] }
 0x128   :  { %1404 = vmatprep.subr.bf16.mxu0 %v1403_v26  ;;  %v699_v26 = vld [vmem:[%s2177_s4 + $0x1b8] sm:$0xff]  ;;  %v1421_v28 = vpack.c.bf16 %v688_v18, %v680_v17 }
 0x12b   :  { %1406 = vmatpush1.bf16.msra.mxu0 %v1405_v31  ;;  %v1423_v31 = vpack.c.bf16 %v705_v25, %v697_v24 }
 0x12c   :  { %1408 = vmatprep.subr.bf16.mxu0 %v1407_v38 }
 0x12f   :  { %1410 = vmatpush1.bf16.msra.mxu0 %v1409_v46 }
 0x130   :  { %1428 = vmatprep.subr.bf16.mxu0 %v1427_v50 }
 0x1f5   :  { %v554_v54 = vpop.f32.mrb[4].mxu0 }
 0x1f6   :  { %v558_v55 = vmax.f32 %v554_v54, 0.0  ;;  %v1233_v56 = vpop.f32.mrb[5].mxu0 }
 0x1f8   :  { %1237 = vmatmul.mubr.msk.f32.vlgmr.msra.gmra.mrb[4].mxu1 %vm560_vm3, %v558_v55 }
 0x1f9   :  { %775 = vmatprep.mubr.f32.mxu1 %v1481_v36  ;;  %1382 = vmatpush1.bf16.msra.mxu1 %v1381_v1  ;;  %v1413_v1 = vpack.c.bf16 %v656_v58, %v648_v57 }
 0x1fa   :  { %1384 = vmatprep.subr.bf16.mxu1 %v1383_v8  ;;  %v674_v8 = vld [vmem:[%s2177_s4 + $0xf0] sm:$0xff] }
 0x1fb   :  { %v1433_v16 = vpack.c.bf16 %v674_v8, %v666_v7 }
 0x1fd   :  { %1386 = vmatpush1.bf16.msra.mxu1 %v1385_v14  ;;  %v691_v14 = vld [vmem:[%s2177_s4 + $0x178] sm:$0xff] }
 0x1fe   :  { %1388 = vmatprep.subr.bf16.mxu1 %v1387_v21  ;;  %v1435_v20 = vpack.c.bf16 %v691_v14, %v683_v12  ;;  %v682_v21 = vld [vmem:[%s2177_s4 + $0x130] sm:$0xff] }
 0x1ff   :  { %v1437_v29 = vpack.c.bf16 %v690_v23, %v682_v21 }
 0x201   :  { %1390 = vmatpush1.bf16.msra.mxu1 %v1389_v27  ;;  %v707_v27 = vld [vmem:[%s2177_s4 + $0x1f8] sm:$0xff] }
 0x202   :  { %1392 = vmatprep.subr.bf16.mxu1 %v1391_v37  ;;  %v1439_v33 = vpack.c.bf16 %v707_v27, %v699_v26  ;;  %v1425_v37 = vpack.c.bf16 %v704_v34, %v696_v30 }
 0x205   :  { %1394 = vmatpush1.bf16.msra.mxu1 %v1393_v42 }
 0x206   :  { %1412 = vmatprep.subr.bf16.mxu1 %v1411_v47 }
 0x2cb   :  { %v634_v51 = vpop.f32.mrb[4].mxu1 }
 0x2cc   :  { %v638_v52 = vsub.f32 0.0, %v634_v51  ;;  %v1238_v53 = vpop.f32.mrb[5].mxu1 }
 0x2ce   :  { %v639_v54 = vmul.f32 1.442695, %v638_v52 }
 0x2d0   :  { %1450 = vpow2.f32 %v639_v54 }
 0x2da   :  { %v1451_v55 = vpop.eup %1450 }
 0x2db   :  { %v641_v56 = vadd.f32 1.0, %v1451_v55 }
 0x2dd   :  { %1452 = vrcp.f32 %v641_v56 }
 0x2e7   :  { %v1453_v10 = vpop.eup %1452 }
 0x2e8   :  { %1060 = vmatmul.mubr.msk.f32.vlgmr.msra.gmra.mrb[6].mxu1 %vm484_vm2, %v1453_v10  ;;  %1061 = vmatmul.mubr.msk.f32.vlgmr.msra.gmra.mrb[6].mxu0 %vm484_vm2, %v1453_v10 }
 0x2e9   :  { %1414 = vmatpush1.bf16.msra.mxu1 %v1413_v1  ;;  %1430 = vmatpush1.bf16.msra.mxu0 %v1429_v2 }
 0x2ea   :  { %1416 = vmatprep.subr.bf16.mxu1 %v1415_v5  ;;  %1432 = vmatprep.subr.bf16.mxu0 %v1431_v6 }
 0x2eb   :  { %917 = vmatprep.mubr.f32.mxu1 %v1481_v36  ;;  %988 = vmatprep.mubr.f32.mxu0 %v1481_v36  ;;  %v698_v36 = vld [vmem:[%s2177_s4 + $0x1b0] sm:$0xff]  ;;  %s1482_s4 = smov [#allocation2]  }
 0x2ec   :  { %v1441_v38 = vpack.c.bf16 %v706_v35, %v698_v36  ;;  %s1049_s26 = sshll.u32 %s1482_s4, 4  ;;  %s1050_s26 = int_to_ptr.vmem [resolvable:$true] %s1049_s26 }
 0x2ed   :  { %1418 = vmatpush1.bf16.msra.mxu1 %v1417_v15  ;;  %1434 = vmatpush1.bf16.msra.mxu0 %v1433_v16  ;;  %s1454_s27 = scalar_lea.vmem %s1050_s26, 256  ;;  %p1459_p1 = scmp.lt.s32.totalorder %s1050_s26, %s1050_s26 }
 0x2ee   :  { %1420 = vmatprep.subr.bf16.mxu1 %v1419_v19  ;;  %1436 = vmatprep.subr.bf16.mxu0 %v1435_v20  ;;  %p1455_p0 = scmp.ne.s32.totalorder %s1050_s26, %s1454_s27  ;;  %p1460_p2 = scmp.lt.s32.totalorder %s1454_s27, %s1454_s27 }
 0x2f0   :  { %p1461_p3 = por %p1460_p2, %p1459_p1 }
 0x2f1   :  { %1422 = vmatpush1.bf16.msra.mxu1 %v1421_v28  ;;  %1438 = vmatpush1.bf16.msra.mxu0 %v1437_v29 }
 0x2f2   :  { %1424 = vmatprep.subr.bf16.mxu1 %v1423_v31  ;;  %1440 = vmatprep.subr.bf16.mxu0 %v1439_v33  ;;  %p1462_p4 = pnand %p1461_p3, %p1455_p0 }
 0x2f5   :  { %1426 = vmatpush1.bf16.msra.mxu1 %v1425_v37  ;;  %1442 = vmatpush1.bf16.msra.mxu0 %v1441_v38 }
 0x2f8   :  { %1062 = vmatmul.mubr.msk.f32.vlgmr.msra.gmra.mrb[8].mxu1 %vm484_vm2, %v1453_v10  ;;  %1063 = vmatmul.mubr.msk.f32.vlgmr.msra.gmra.mrb[8].mxu0 %vm484_vm2, %v1453_v10 }
 0x3bb   :  { %v777_v39 = vpop.f32.mrb[6].mxu1  ;;  %v848_v40 = vpop.f32.mrb[6].mxu0 }
 0x3bc   :  { %v779_v41 = vpop.f32.mrb[7].mxu1  ;;  %v850_v42 = vpop.f32.mrb[7].mxu0 }
 0x3bd   :  { %v1003_v43 = vcombine.low %v777_v39, %v779_v41  ;;  %v1004_v44 = vcombine.low %v848_v40, %v850_v42 }
 0x3bf   :  { %v1011_v45 = vrot.slane %v1003_v43, %v1663_v13  ;;  %v1018_v46 = vrot.slane %v1004_v44, %v1663_v13 }
 0x3c1   :  { %v1019_v47 = vcombine.low %v1011_v45, %v1018_v46 }
 0x3c3   :  { %v1039_v48 = vmul.f32 %v1019_v47, %v1683_v22 }
 0x3c5   :  { %1041 = vst [vmem:[#allocation2] sm:$0xff] %v1039_v48 }
 0x3cb   :  { %v919_v49 = vpop.f32.mrb[8].mxu1  ;;  %v990_v50 = vpop.f32.mrb[8].mxu0 }
 0x3cc   :  { %v921_v51 = vpop.f32.mrb[9].mxu1  ;;  %v992_v52 = vpop.f32.mrb[9].mxu0 }
 0x3cd   :  { %v1020_v53 = vcombine.low %v919_v49, %v921_v51  ;;  %v1021_v54 = vcombine.low %v990_v50, %v992_v52 }
 0x3cf   :  { %v1028_v55 = vrot.slane %v1020_v53, %v1663_v13  ;;  %v1035_v56 = vrot.slane %v1021_v54, %v1663_v13 }
 0x3d1   :  { %v1036_v57 = vcombine.low %v1028_v55, %v1035_v56 }
 0x3d3   :  { %v1040_v58 = vmul.f32 %v1036_v57, %v1828_v32 }
 0x3d5   :  { %1042 = vst [vmem:[#allocation2 + $0x8] sm:$0xff] %v1040_v58 }
 0x3d6   :  { %1465 = shalt.err (!%p1462_p4)
}
 0x3d7   :  { %s1466_s29 = scalar_lea.hbm %s2178_s5, 256 }
 0x3d8   :  { %p1467_p5 = scmp.ne.s32.totalorder %s2178_s5, %s1466_s29  ;;  %p1470_p6 = scmp.lt.u32.totalorder %s1466_s29, %s2178_s5 }
 0x3da   :  { %p1472_p7 = pnand %p1470_p6, %p1467_p5 }
 0x3dc   :  { %1475 = shalt.err (!%p1472_p7)
}
 0x3dd   :  { %1052 = dma.vmem_to_hbm [thread:$0]  %s1050_s26, 256, %s2178_s5, [#allocation3]  }
 0x3de   :  { %1476 = dma.done.wait [#allocation3], 256  }
 0x3df   :  { %1477 = vsyncadd [#allocation3], 4294967040 }
 0x3e0   :  { %1056 = vsyncpa [#allocation3], 1 }

</bundles_post_ra>
